<compile_context>
chip_gen: v5e
topology: v5e:2x2
jax: 0.10.0
libtpu: 0.0.40
codegen_flags: <defaults>
</compile_context>

<pallas_src>
import math

import jax
import jax.numpy as jnp
from jax.experimental import pallas as pl
from jax.experimental.pallas import tpu as pltpu  # noqa: F401  (TPU tuning hooks)


def _rnn_kernel(x2d_ref, wx_ref, wh_ref, bh_ref, wo_ref, bo_ref, o_ref):
    """Fully fused VanillaRNN forward in a single kernel invocation.

    x2d_ref: (T*B, D)  time-major flattened input (row t*B + b == x[b, t, :])
    wx_ref : (D, H)
    wh_ref : (H, H)
    bh_ref : (1, H)
    wo_ref : (H, C)
    bo_ref : (1, C)
    o_ref  : (B, C)
    """
    B = o_ref.shape[0]
    T = x2d_ref.shape[0] // B

    wx = wx_ref[...]
    wh = wh_ref[...]  # resident for the whole recurrence

    # Input projection for all time steps in one MXU pass; bh folded in here.
    wxx = jnp.dot(x2d_ref[...], wx, preferred_element_type=jnp.float32) + bh_ref[...]

    # t = 0: h_prev == 0, so h = tanh(wxx_0) (skips one matmul).
    h = jnp.tanh(wxx[0:B, :])
    # Statically unrolled serial recurrence (T is small and trace-time known).
    for t in range(1, T):
        h = jnp.tanh(wxx[t * B:(t + 1) * B, :]
                     + jnp.dot(h, wh, preferred_element_type=jnp.float32))

    out = jnp.dot(h, wo_ref[...], preferred_element_type=jnp.float32) + bo_ref[...]
    o_ref[...] = out.astype(o_ref.dtype)


@jax.jit
def vanilla_rnn_forward(x, Wx, Wh, bh, Wo, bo):
    """x: (batch, seq_length, input_dim) -> logits (batch, num_classes)."""
    B, T, D = x.shape
    H = Wx.shape[1]
    C = Wo.shape[1]

    # Time-major flatten of x; under jit this is one tiny fused copy feeding
    # the pallas_call (no standalone projection / padding / slicing ops).
    x2d = jnp.transpose(x, (1, 0, 2)).reshape(T * B, D).astype(jnp.float32)

    return pl.pallas_call(
        _rnn_kernel,
        out_shape=jax.ShapeDtypeStruct((B, C), jnp.float32),
        # No grid / no BlockSpecs: single invocation; all (tiny) operands are
        # resident in VMEM for the duration of the kernel.
    )(
        x2d,
        Wx.astype(jnp.float32),
        Wh.astype(jnp.float32),
        bh.reshape(1, H).astype(jnp.float32),
        Wo.astype(jnp.float32),
        bo.reshape(1, C).astype(jnp.float32),
    )


def vanilla_rnn_reference(x, Wx, Wh, bh, Wo, bo):
    """Pure-JAX reference mirroring the PyTorch forward."""
    B = x.shape[0]
    H = Wx.shape[1]
    x_tbd = jnp.transpose(x, (1, 0, 2))
    h = jnp.zeros((B, H), jnp.float32)
    for t in range(x_tbd.shape[0]):
        wxx = x_tbd[t] @ Wx
        wxh = h @ Wh + bh
        h = jnp.tanh(wxx + wxh)
    return h @ Wo + bo


if __name__ == "__main__":
    # Small shapes consistent with the module's forward.
    seq_length = 8
    input_dim = 4
    num_hidden = 32
    num_classes = 10
    batch_size = 2

    key = jax.random.PRNGKey(0)
    k_x, k_wx, k_wh, k_bh, k_wo, k_bo = jax.random.split(key, 6)

    # reset_parameters: uniform(-stdv, stdv) with stdv = 1/sqrt(num_hidden)
    stdv = 1.0 / math.sqrt(num_hidden)

    def init(k, shape):
        return jax.random.uniform(k, shape, jnp.float32, -stdv, stdv)

    Wx = init(k_wx, (input_dim, num_hidden))
    Wh = init(k_wh, (num_hidden, num_hidden))
    bh = init(k_bh, (num_hidden,))
    Wo = init(k_wo, (num_hidden, num_classes))
    bo = init(k_bo, (num_classes,))

    x = jax.random.normal(k_x, (batch_size, seq_length, input_dim), jnp.float32)

    out = jax.block_until_ready(vanilla_rnn_forward(x, Wx, Wh, bh, Wo, bo))
    ref = vanilla_rnn_reference(x, Wx, Wh, bh, Wo, bo)

    assert out.shape == (batch_size, num_classes)
    assert jnp.allclose(out, ref, atol=1e-5, rtol=1e-5), "mismatch vs reference"

    print("KERNEL_OK")
</pallas_src>

<mosaic_0001>
module attributes {stable_mosaic.version = 11 : i64} {
  func.func @_rnn_kernel(%arg0: memref<16x4xf32, #tpu.memory_space<vmem>>, %arg1: memref<4x32xf32, #tpu.memory_space<vmem>>, %arg2: memref<32x32xf32, #tpu.memory_space<vmem>>, %arg3: memref<1x32xf32, #tpu.memory_space<vmem>>, %arg4: memref<32x10xf32, #tpu.memory_space<vmem>>, %arg5: memref<1x10xf32, #tpu.memory_space<vmem>>, %arg6: memref<2x10xf32, #tpu.memory_space<vmem>>) attributes {dimension_semantics = [], scalar_prefetch = 0 : i64, scratch_operands = 0 : i64, tpu.core_type = #tpu.core_type<tc>} {
    %c0 = arith.constant 0 : index
    %c0_0 = arith.constant 0 : index
    %0 = vector.load %arg1[%c0, %c0_0] : memref<4x32xf32, #tpu.memory_space<vmem>>, vector<4x32xf32>
    %c0_1 = arith.constant 0 : index
    %c0_2 = arith.constant 0 : index
    %1 = vector.load %arg2[%c0_1, %c0_2] : memref<32x32xf32, #tpu.memory_space<vmem>>, vector<32x32xf32>
    %c0_3 = arith.constant 0 : index
    %c0_4 = arith.constant 0 : index
    %2 = vector.load %arg0[%c0_3, %c0_4] : memref<16x4xf32, #tpu.memory_space<vmem>>, vector<16x4xf32>
    %cst = arith.constant dense<0.000000e+00> : vector<16x32xf32>
    %3 = tpu.matmul %2, %0, %cst {dimension_numbers = #tpu.dot_dimension_numbers<[1], [0], [0], [1], [0, 0, 1, 1], [], []>} : vector<16x4xf32>, vector<4x32xf32>, vector<16x32xf32> -> vector<16x32xf32>
    %c0_5 = arith.constant 0 : index
    %c0_6 = arith.constant 0 : index
    %4 = vector.load %arg3[%c0_5, %c0_6] : memref<1x32xf32, #tpu.memory_space<vmem>>, vector<1x32xf32>
    %5 = vector.broadcast %4 : vector<1x32xf32> to vector<16x32xf32>
    %6 = arith.addf %3, %5 : vector<16x32xf32>
    %7 = vector.extract_strided_slice %6 {offsets = [0, 0], sizes = [2, 32], strides = [1, 1]} : vector<16x32xf32> to vector<2x32xf32>
    %8 = math.tanh %7 : vector<2x32xf32>
    %9 = vector.extract_strided_slice %6 {offsets = [2, 0], sizes = [2, 32], strides = [1, 1]} : vector<16x32xf32> to vector<2x32xf32>
    %cst_7 = arith.constant dense<0.000000e+00> : vector<2x32xf32>
    %10 = tpu.matmul %8, %1, %cst_7 {dimension_numbers = #tpu.dot_dimension_numbers<[1], [0], [0], [1], [0, 0, 1, 1], [], []>} : vector<2x32xf32>, vector<32x32xf32>, vector<2x32xf32> -> vector<2x32xf32>
    %11 = arith.addf %9, %10 : vector<2x32xf32>
    %12 = math.tanh %11 : vector<2x32xf32>
    %13 = vector.extract_strided_slice %6 {offsets = [4, 0], sizes = [2, 32], strides = [1, 1]} : vector<16x32xf32> to vector<2x32xf32>
    %cst_8 = arith.constant dense<0.000000e+00> : vector<2x32xf32>
    %14 = tpu.matmul %12, %1, %cst_8 {dimension_numbers = #tpu.dot_dimension_numbers<[1], [0], [0], [1], [0, 0, 1, 1], [], []>} : vector<2x32xf32>, vector<32x32xf32>, vector<2x32xf32> -> vector<2x32xf32>
    %15 = arith.addf %13, %14 : vector<2x32xf32>
    %16 = math.tanh %15 : vector<2x32xf32>
    %17 = vector.extract_strided_slice %6 {offsets = [6, 0], sizes = [2, 32], strides = [1, 1]} : vector<16x32xf32> to vector<2x32xf32>
    %cst_9 = arith.constant dense<0.000000e+00> : vector<2x32xf32>
    %18 = tpu.matmul %16, %1, %cst_9 {dimension_numbers = #tpu.dot_dimension_numbers<[1], [0], [0], [1], [0, 0, 1, 1], [], []>} : vector<2x32xf32>, vector<32x32xf32>, vector<2x32xf32> -> vector<2x32xf32>
    %19 = arith.addf %17, %18 : vector<2x32xf32>
    %20 = math.tanh %19 : vector<2x32xf32>
    %21 = vector.extract_strided_slice %6 {offsets = [8, 0], sizes = [2, 32], strides = [1, 1]} : vector<16x32xf32> to vector<2x32xf32>
    %cst_10 = arith.constant dense<0.000000e+00> : vector<2x32xf32>
    %22 = tpu.matmul %20, %1, %cst_10 {dimension_numbers = #tpu.dot_dimension_numbers<[1], [0], [0], [1], [0, 0, 1, 1], [], []>} : vector<2x32xf32>, vector<32x32xf32>, vector<2x32xf32> -> vector<2x32xf32>
    %23 = arith.addf %21, %22 : vector<2x32xf32>
    %24 = math.tanh %23 : vector<2x32xf32>
    %25 = vector.extract_strided_slice %6 {offsets = [10, 0], sizes = [2, 32], strides = [1, 1]} : vector<16x32xf32> to vector<2x32xf32>
    %cst_11 = arith.constant dense<0.000000e+00> : vector<2x32xf32>
    %26 = tpu.matmul %24, %1, %cst_11 {dimension_numbers = #tpu.dot_dimension_numbers<[1], [0], [0], [1], [0, 0, 1, 1], [], []>} : vector<2x32xf32>, vector<32x32xf32>, vector<2x32xf32> -> vector<2x32xf32>
    %27 = arith.addf %25, %26 : vector<2x32xf32>
    %28 = math.tanh %27 : vector<2x32xf32>
    %29 = vector.extract_strided_slice %6 {offsets = [12, 0], sizes = [2, 32], strides = [1, 1]} : vector<16x32xf32> to vector<2x32xf32>
    %cst_12 = arith.constant dense<0.000000e+00> : vector<2x32xf32>
    %30 = tpu.matmul %28, %1, %cst_12 {dimension_numbers = #tpu.dot_dimension_numbers<[1], [0], [0], [1], [0, 0, 1, 1], [], []>} : vector<2x32xf32>, vector<32x32xf32>, vector<2x32xf32> -> vector<2x32xf32>
    %31 = arith.addf %29, %30 : vector<2x32xf32>
    %32 = math.tanh %31 : vector<2x32xf32>
    %33 = vector.extract_strided_slice %6 {offsets = [14, 0], sizes = [2, 32], strides = [1, 1]} : vector<16x32xf32> to vector<2x32xf32>
    %cst_13 = arith.constant dense<0.000000e+00> : vector<2x32xf32>
    %34 = tpu.matmul %32, %1, %cst_13 {dimension_numbers = #tpu.dot_dimension_numbers<[1], [0], [0], [1], [0, 0, 1, 1], [], []>} : vector<2x32xf32>, vector<32x32xf32>, vector<2x32xf32> -> vector<2x32xf32>
    %35 = arith.addf %33, %34 : vector<2x32xf32>
    %36 = math.tanh %35 : vector<2x32xf32>
    %c0_14 = arith.constant 0 : index
    %c0_15 = arith.constant 0 : index
    %37 = vector.load %arg4[%c0_14, %c0_15] : memref<32x10xf32, #tpu.memory_space<vmem>>, vector<32x10xf32>
    %cst_16 = arith.constant dense<0.000000e+00> : vector<2x10xf32>
    %38 = tpu.matmul %36, %37, %cst_16 {dimension_numbers = #tpu.dot_dimension_numbers<[1], [0], [0], [1], [0, 0, 1, 1], [], []>} : vector<2x32xf32>, vector<32x10xf32>, vector<2x10xf32> -> vector<2x10xf32>
    %c0_17 = arith.constant 0 : index
    %c0_18 = arith.constant 0 : index
    %39 = vector.load %arg5[%c0_17, %c0_18] : memref<1x10xf32, #tpu.memory_space<vmem>>, vector<1x10xf32>
    %40 = vector.broadcast %39 : vector<1x10xf32> to vector<2x10xf32>
    %41 = arith.addf %38, %40 : vector<2x10xf32>
    %c0_19 = arith.constant 0 : index
    %c0_20 = arith.constant 0 : index
    %42 = vector.load %arg6[%c0_19, %c0_20] : memref<2x10xf32, #tpu.memory_space<vmem>>, vector<2x10xf32>
    tpu.vector_store %arg6[%c0_19, %c0_20], %41 {strides = array<i32>} : memref<2x10xf32, #tpu.memory_space<vmem>>, vector<2x10xf32>,
    return
  }
}

</mosaic_0001>

<bundles_post_ra>
// kernel: vanilla_rnn_forward.1
= control target key start
LH: loop header
LB: loop body
LE: loop exit
PB: predicated region body
PF: predicated region fallthrough
CT: control target
= control target key end

     0   :  { %vm42_vm0 = vcmask 1043456   ;;  %vm35_vm1 = vcmask 31744   ;;  %s463_s0 = inlined_call_operand.vmem [shape: f32[16,4], index: 0, kind: input, shape index: {}]   ;;  %s464_s1 = inlined_call_operand.vmem [shape: f32[4,32], index: 1, kind: input, shape index: {}]   ;;  %s465_s2 = inlined_call_operand.vmem [shape: f32[32,32], index: 2, kind: input, shape index: {}]   ;;  %s466_s3 = inlined_call_operand.vmem [shape: f32[1,32], index: 3, kind: input, shape index: {}]   ;;  %s467_s4 = inlined_call_operand.vmem [shape: f32[32,10], index: 4, kind: input, shape index: {}]   ;;  %s468_s5 = inlined_call_operand.vmem [shape: f32[1,10], index: 5, kind: input, shape index: {}]   ;;  %s469_s6 = inlined_call_operand.hbm [shape: f32[2,10], index: 6, kind: output, shape index: {}]  }
   0x1   :  { %v24_v0 = vld [vmem:[%s464_s1] sm:$0xf] }
   0x2   :  { %v29_v1 = vld [vmem:[%s463_s0] sm:$0xff]  ;;  %319 = vmatpush.msk.msra.mxu0 %vm42_vm0, %v24_v0 }
   0x3   :  { %320 = vmatmul.msk.f32.vlgmr.msra.gmra.mxu0 %vm35_vm1, %v29_v1 }
   0x4   :  { %11 = vsyncpa [#allocation3], 0  ;;  %v28_v2 = vld [vmem:[%s465_s2 + $0x18] sm:$0xff]  ;;  %v27_v3 = vld [vmem:[%s465_s2 + $0x10] sm:$0xff]  ;;  %vm70_vm2 = vcmask 261120   ;;  %s375_s19 = smov [#allocation2]  }
   0x5   :  { %86 = vmatpush.msra.mxu1 %v28_v2  ;;  %115 = vmatpush.msra.mxu2 %v28_v2  ;;  %v26_v4 = vld [vmem:[%s465_s2 + $0x8] sm:$0xff]  ;;  %v25_v5 = vld [vmem:[%s465_s2] sm:$0xff]  ;;  %v272_v41 = vld [vmem:[%s467_s4 + $0x18] sm:$0xff]  ;;  %s308_s20 = sshll.u32 %s375_s19, 4  ;;  %s310_s23 = sshll.u32 %s469_s6, 4  ;;  %vm301_vm3 = vcmask 74752   ;;  %s309_s20 = int_to_ptr.vmem [resolvable:$true] %s308_s20  ;;  %s311_s23 = int_to_ptr.hbm [resolvable:$true] %s310_s23 }
   0x6   :  { %144 = vmatpush.msra.mxu3 %v28_v2  ;;  %256 = vmatpush.msrb.mxu0 %v28_v2  ;;  %v331_v6 = vld [vmem:[%s466_s3] ss:$0 sm:$0xff]  ;;  %v30_v20 = vld [vmem:[%s463_s0 + $0x8] sm:$0xff]  ;;  %v271_v42 = vld [vmem:[%s467_s4 + $0x10] sm:$0xff] }
   0x7   :  { %87 = vmatpush.msra.mxu1 %v27_v3  ;;  %116 = vmatpush.msra.mxu2 %v27_v3  ;;  %v270_v43 = vld [vmem:[%s467_s4 + $0x8] sm:$0xff]  ;;  %v269_v44 = vld [vmem:[%s467_s4] sm:$0xff] }
   0x8   :  { %145 = vmatpush.msra.mxu3 %v27_v3  ;;  %257 = vmatpush.msrb.mxu0 %v27_v3  ;;  %v332_v50 = vld [vmem:[%s468_s5] ss:$0 sm:$0xff] }
   0x9   :  { %88 = vmatpush.msra.mxu1 %v26_v4  ;;  %117 = vmatpush.msra.mxu2 %v26_v4 }
   0xa   :  { %146 = vmatpush.msra.mxu3 %v26_v4  ;;  %258 = vmatpush.msrb.mxu0 %v26_v4 }
   0xb   :  { %89 = vmatpush.msra.mxu1 %v25_v5  ;;  %118 = vmatpush.msra.mxu2 %v25_v5 }
   0xc   :  { %147 = vmatpush.msra.mxu3 %v25_v5  ;;  %259 = vmatpush.msrb.mxu0 %v25_v5 }
   0xd   :  { %173 = vmatpush.msrb.mxu1 %v28_v2  ;;  %198 = vmatpush.msrb.mxu2 %v28_v2 }
   0xe   :  { %227 = vmatpush.msrb.mxu3 %v28_v2  ;;  %321 = vmatmul.msk.f32.gmra.mxu0 %vm35_vm1, %v30_v20 }
   0xf   :  { %174 = vmatpush.msrb.mxu1 %v27_v3  ;;  %199 = vmatpush.msrb.mxu2 %v27_v3 }
  0x10   :  { %228 = vmatpush.msrb.mxu3 %v27_v3 }
  0x11   :  { %175 = vmatpush.msrb.mxu1 %v26_v4  ;;  %200 = vmatpush.msrb.mxu2 %v26_v4 }
  0x12   :  { %229 = vmatpush.msrb.mxu3 %v26_v4 }
  0x13   :  { %176 = vmatpush.msrb.mxu1 %v25_v5  ;;  %201 = vmatpush.msrb.mxu2 %v25_v5 }
  0x14   :  { %230 = vmatpush.msrb.mxu3 %v25_v5 }
  0x80   :  { %v63_v7 = vpop.f32.mrf.mxu0 }
  0x81   :  { %v64_v8 = vadd.f32 %v331_v6, %v63_v7 }
  0x83   :  { %333 = vtanh.f32 %v64_v8 }
  0x89   :  { %v334_v9 = vpop.eup %333 }
  0x8a   :  { %322 = vmatmul.msk.f32.vlgmr.msra.gmra.mxu1 %vm70_vm2, %v334_v9 }
  0x8b   :  { %v66_v26 = vpop.f32.mrf.mxu0  ;;  %293 = vmatpush.msra.mxu1 %v272_v41 }
  0x8c   :  { %v67_v27 = vadd.f32 %v331_v6, %v66_v26 }
  0x8d   :  { %294 = vmatpush.msra.mxu1 %v271_v42 }
  0x8f   :  { %295 = vmatpush.msra.mxu1 %v270_v43 }
  0x91   :  { %296 = vmatpush.msra.mxu1 %v269_v44 }
 0x107   :  { %v91_v10 = vpop.f32.mrf.mxu1 }
 0x108   :  { %v95_v11 = vrot.slane %v91_v10, 6 }
 0x10a   :  { %v97_v12 = vadd.f32 %v95_v11, %v64_v8 }
 0x10c   :  { %335 = vtanh.f32 %v97_v12 }
 0x112   :  { %v336_v13 = vpop.eup %335 }
 0x113   :  { %v100_v14 = vrot.slane %v336_v13, 2 }
 0x115   :  { %323 = vmatmul.msk.f32.vlgmr.msra.gmra.mxu2 %vm70_vm2, %v100_v14 }
 0x198   :  { %v120_v15 = vpop.f32.mrf.mxu2 }
 0x199   :  { %v124_v16 = vrot.slane %v120_v15, 4 }
 0x19b   :  { %v126_v17 = vadd.f32 %v124_v16, %v64_v8 }
 0x19d   :  { %337 = vtanh.f32 %v126_v17 }
 0x1a3   :  { %v338_v18 = vpop.eup %337 }
 0x1a4   :  { %v129_v19 = vrot.slane %v338_v18, 4 }
 0x1a6   :  { %324 = vmatmul.msk.f32.vlgmr.msra.gmra.mxu3 %vm70_vm2, %v129_v19 }
 0x229   :  { %v149_v21 = vpop.f32.mrf.mxu3 }
 0x22a   :  { %v153_v22 = vrot.slane %v149_v21, 2 }
 0x22c   :  { %v155_v23 = vadd.f32 %v153_v22, %v64_v8 }
 0x22e   :  { %339 = vtanh.f32 %v155_v23 }
 0x234   :  { %v340_v24 = vpop.eup %339 }
 0x235   :  { %v158_v25 = vrot.slane %v340_v24, 6 }
 0x237   :  { %325 = vmatmul.msk.f32.vlgmr.msrb.gmra.mxu1 %vm70_vm2, %v158_v25 }
 0x2b4   :  { %v178_v28 = vpop.f32.mrf.mxu1 }
 0x2b5   :  { %v181_v29 = vadd.f32 %v178_v28, %v67_v27 }
 0x2b7   :  { %341 = vtanh.f32 %v181_v29 }
 0x2bd   :  { %v342_v30 = vpop.eup %341 }
 0x2be   :  { %326 = vmatmul.msk.f32.vlgmr.msrb.gmra.mxu2 %vm70_vm2, %v342_v30 }
 0x341   :  { %v203_v31 = vpop.f32.mrf.mxu2 }
 0x342   :  { %v207_v32 = vrot.slane %v203_v31, 6 }
 0x344   :  { %v209_v33 = vadd.f32 %v207_v32, %v67_v27 }
 0x346   :  { %343 = vtanh.f32 %v209_v33 }
 0x34c   :  { %v344_v34 = vpop.eup %343 }
 0x34d   :  { %v212_v35 = vrot.slane %v344_v34, 2 }
 0x34f   :  { %327 = vmatmul.msk.f32.vlgmr.msrb.gmra.mxu3 %vm70_vm2, %v212_v35 }
 0x3d2   :  { %v232_v36 = vpop.f32.mrf.mxu3 }
 0x3d3   :  { %v236_v37 = vrot.slane %v232_v36, 4 }
 0x3d5   :  { %v238_v38 = vadd.f32 %v236_v37, %v67_v27 }
 0x3d7   :  { %345 = vtanh.f32 %v238_v38 }
 0x3dd   :  { %v346_v39 = vpop.eup %345 }
 0x3de   :  { %v241_v40 = vrot.slane %v346_v39, 4 }
 0x3e0   :  { %328 = vmatmul.msk.f32.vlgmr.msrb.gmra.mxu0 %vm70_vm2, %v241_v40 }
 0x45d   :  { %v261_v45 = vpop.f32.mrf.mxu0 }
 0x45e   :  { %v265_v46 = vrot.slane %v261_v45, 2 }
 0x460   :  { %v267_v47 = vadd.f32 %v265_v46, %v67_v27 }
 0x462   :  { %347 = vtanh.f32 %v267_v47 }
 0x468   :  { %v348_v48 = vpop.eup %347 }
 0x469   :  { %v278_v49 = vrot.slane %v348_v48, 6 }
 0x46b   :  { %329 = vmatmul.msk.f32.vlgmr.msra.gmra.mxu1 %vm70_vm2, %v278_v49 }
 0x4e8   :  { %v298_v51 = vpop.f32.mrf.mxu1 }
 0x4e9   :  { %v299_v52 = vadd.f32 %v332_v50, %v298_v51 }
 0x4eb   :  { %302 = vst.msk [vmem:[#allocation2] sm:$0x3] %vm301_vm3, %v299_v52 }
 0x4ec   :  { %313 = dma.vmem_to_hbm [thread:$0]  %s309_s20, 32, %s311_s23, [#allocation3]  }
 0x4ed   :  { %373 = dma.done.wait [#allocation3], 32  }
 0x4ee   :  { %374 = vsyncadd [#allocation3], 4294967264 }
 0x4ef   :  { %318 = vsyncpa [#allocation3], 1 }

</bundles_post_ra>
